<compile_context>
chip_gen: v5e
topology: v5e:2x2
jax: 0.10.0
libtpu: 0.0.40
codegen_flags: <defaults>
</compile_context>

<pallas_src>
import math

import jax
import jax.numpy as jnp
from jax import lax
from jax.experimental import pallas as pl
from jax.experimental.pallas import tpu as pltpu

# ---------------- model dims (small, consistent with the module) ------------
B = 2        # batch
S = 8        # num_tokens
D = 32       # hidden_dim
T_MLP = 16   # tokens_mlp_dim
C_MLP = 64   # channels_mlp_dim
EPS = 1e-6   # layernorm_epsilon

_INV_SQRT2 = 1.0 / math.sqrt(2.0)


def _round8(n):
    return ((n + 7) // 8) * 8


# ---- packed-parameter slab layout (all regions start on a sublane multiple) --
ROW_VEC = 0                                   # rows 0..5: g1,b1,g2,b2,bc1,bc2
ROW_W1 = ROW_VEC + 8                          # (B*T, B*S) block-diag wt1^T
ROW_BT1 = ROW_W1 + _round8(B * T_MLP)         # (B*T, 1) token-mix bias 1 (column)
ROW_W2 = ROW_BT1 + _round8(B * T_MLP)         # (B*S, B*T) block-diag wt2^T
ROW_BT2 = ROW_W2 + _round8(B * S)             # (B*S, 1) token-mix bias 2 (column)
ROW_WC1 = ROW_BT2 + _round8(B * S)            # (D, C_MLP)
ROW_WC2 = ROW_WC1 + _round8(D)                # (C_MLP, D)
SLAB_ROWS = ROW_WC2 + _round8(C_MLP)
SLAB_COLS = 128                               # 128-lane rows (review suggestion)


def _gelu_exact(x):
    # nn.GELU() default is the exact (erf) formulation.
    return 0.5 * x * (1.0 + lax.erf(x * jnp.float32(_INV_SQRT2)))


def _layernorm_fused(x, gamma, beta, eps):
    # Single-pass LayerNorm over the last axis (biased variance, PyTorch
    # semantics): sum and sum-of-squares are independent reductions,
    # var = E[x^2] - mean^2 (clamped against cancellation).
    n = x.shape[-1]
    inv_n = jnp.float32(1.0 / n)
    s = jnp.sum(x, axis=-1, keepdims=True)
    s2 = jnp.sum(x * x, axis=-1, keepdims=True)
    mean = s * inv_n
    var = jnp.maximum(s2 * inv_n - mean * mean, 0.0)
    inv = lax.rsqrt(var + eps)
    return (x - mean) * inv * gamma + beta


def mixer_block_kernel(x_ref, p_ref, o_ref):
    # x_ref: (B, S, D); p_ref: (SLAB_ROWS, 128); o_ref: (B, S, D)
    # (B,S,D)->(B*S,D) merges leading dims only; layout-free while S is a
    # multiple of the f32 sublane tile (8).  Revisit if S or dtype change.
    x = x_ref[...].astype(jnp.float32).reshape(B * S, D)        # (B*S, D)

    # ---- static slices into the packed parameter slab (zero runtime cost) ----
    g1 = p_ref[0:1, 0:D]
    b1 = p_ref[1:2, 0:D]
    g2 = p_ref[2:3, 0:D]
    b2 = p_ref[3:4, 0:D]
    bc1 = p_ref[4:5, 0:C_MLP]
    bc2 = p_ref[5:6, 0:D]
    w1 = p_ref[ROW_W1:ROW_W1 + B * T_MLP, 0:B * S]              # (B*T, B*S)
    bt1 = p_ref[ROW_BT1:ROW_BT1 + B * T_MLP, 0:1]               # (B*T, 1)
    w2 = p_ref[ROW_W2:ROW_W2 + B * S, 0:B * T_MLP]              # (B*S, B*T)
    bt2 = p_ref[ROW_BT2:ROW_BT2 + B * S, 0:1]                   # (B*S, 1)
    wc1 = p_ref[ROW_WC1:ROW_WC1 + D, 0:C_MLP]                   # (D, C_MLP)
    wc2 = p_ref[ROW_WC2:ROW_WC2 + C_MLP, 0:D]                   # (C_MLP, D)

    # ---- token mixing: plain 2-D matmuls with block-diagonal weights ----
    ln1 = _layernorm_fused(x, g1, b1, EPS)                      # (B*S, D)
    h = jnp.dot(w1, ln1, preferred_element_type=jnp.float32) + bt1   # (B*T, D)
    h = _gelu_exact(h)
    tok = jnp.dot(w2, h, preferred_element_type=jnp.float32) + bt2   # (B*S, D)
    x = x + tok                                                 # residual

    # ---- channel mixing: batch folded into the matmul M dimension ----
    ln2 = _layernorm_fused(x, g2, b2, EPS)                      # (B*S, D)
    h2 = _gelu_exact(
        jnp.dot(ln2, wc1, preferred_element_type=jnp.float32) + bc1)  # (B*S, C)
    ch = jnp.dot(h2, wc2, preferred_element_type=jnp.float32) + bc2   # (B*S, D)

    # (B*S,D)->(B,S,D) is the inverse leading-dim split (layout-free, see above).
    o_ref[...] = (x + ch).reshape(B, S, D).astype(o_ref.dtype)


def pack_params(params):
    """One-time packing of all 12 params into a single (SLAB_ROWS, 128) slab."""
    (g1, b1, wt1, bt1, wt2, bt2, g2, b2, wc1, bc1, wc2, bc2) = params
    eye_b = jnp.eye(B, dtype=jnp.float32)
    w1_bd = jnp.kron(eye_b, wt1.T.astype(jnp.float32))          # (B*T, B*S)
    w2_bd = jnp.kron(eye_b, wt2.T.astype(jnp.float32))          # (B*S, B*T)
    bt1_col = jnp.tile(bt1.reshape(T_MLP, 1), (B, 1))           # (B*T, 1)
    bt2_col = jnp.tile(bt2.reshape(S, 1), (B, 1))               # (B*S, 1)

    slab = jnp.zeros((SLAB_ROWS, SLAB_COLS), jnp.float32)

    def put(s, r, c, a):
        a = jnp.asarray(a, jnp.float32)
        return s.at[r:r + a.shape[0], c:c + a.shape[1]].set(a)

    slab = put(slab, 0, 0, g1.reshape(1, D))
    slab = put(slab, 1, 0, b1.reshape(1, D))
    slab = put(slab, 2, 0, g2.reshape(1, D))
    slab = put(slab, 3, 0, b2.reshape(1, D))
    slab = put(slab, 4, 0, bc1.reshape(1, C_MLP))
    slab = put(slab, 5, 0, bc2.reshape(1, D))
    slab = put(slab, ROW_W1, 0, w1_bd)
    slab = put(slab, ROW_BT1, 0, bt1_col)
    slab = put(slab, ROW_W2, 0, w2_bd)
    slab = put(slab, ROW_BT2, 0, bt2_col)
    slab = put(slab, ROW_WC1, 0, wc1)
    slab = put(slab, ROW_WC2, 0, wc2)
    return slab


@jax.jit
def mixer_block(x, param_slab):
    # Grid-free single invocation: whole activation + one param slab in VMEM,
    # no per-step pipeline overhead, exactly two input DMAs and one output DMA
    # (the output aliases x's HBM buffer).
    return pl.pallas_call(
        mixer_block_kernel,
        out_shape=jax.ShapeDtypeStruct(x.shape, x.dtype),
        in_specs=[pl.BlockSpec(memory_space=pltpu.MemorySpace.VMEM),
                  pl.BlockSpec(memory_space=pltpu.MemorySpace.VMEM)],
        out_specs=pl.BlockSpec(memory_space=pltpu.MemorySpace.VMEM),
        input_output_aliases={0: 0},
    )(x, param_slab)


def init_params(key):
    ks = jax.random.split(key, 8)
    scale = 0.05
    g1 = jnp.ones((1, D), jnp.float32)
    b1 = jnp.zeros((1, D), jnp.float32)
    wt1 = scale * jax.random.normal(ks[0], (S, T_MLP), jnp.float32)
    bt1 = scale * jax.random.normal(ks[1], (1, T_MLP), jnp.float32)
    wt2 = scale * jax.random.normal(ks[2], (T_MLP, S), jnp.float32)
    bt2 = scale * jax.random.normal(ks[3], (1, S), jnp.float32)
    g2 = jnp.ones((1, D), jnp.float32)
    b2 = jnp.zeros((1, D), jnp.float32)
    wc1 = scale * jax.random.normal(ks[4], (D, C_MLP), jnp.float32)
    bc1 = scale * jax.random.normal(ks[5], (1, C_MLP), jnp.float32)
    wc2 = scale * jax.random.normal(ks[6], (C_MLP, D), jnp.float32)
    bc2 = scale * jax.random.normal(ks[7], (1, D), jnp.float32)
    return (g1, b1, wt1, bt1, wt2, bt2, g2, b2, wc1, bc1, wc2, bc2)


def _layernorm_ref(x, gamma, beta, eps):
    mean = jnp.mean(x, axis=-1, keepdims=True)
    var = jnp.mean(jnp.square(x - mean), axis=-1, keepdims=True)
    return (x - mean) * lax.rsqrt(var + eps) * gamma + beta


def mixer_block_ref(x, params):
    # pure-JAX reference (original PyTorch-layout params) for correctness check
    (g1, b1, wt1, bt1, wt2, bt2, g2, b2, wc1, bc1, wc2, bc2) = params
    ln1 = _layernorm_ref(x, g1, b1, EPS)             # (B,S,D)
    out = jnp.swapaxes(ln1, 1, 2)                    # (B,D,S)
    h = _gelu_exact(out @ wt1 + bt1)
    tok = h @ wt2 + bt2                              # (B,D,S)
    x = x + jnp.swapaxes(tok, 1, 2)
    ln2 = _layernorm_ref(x, g2, b2, EPS)
    h2 = _gelu_exact(ln2 @ wc1 + bc1)
    ch = h2 @ wc2 + bc2
    return x + ch


if __name__ == "__main__":
    key = jax.random.PRNGKey(0)
    kx, kp = jax.random.split(key)
    x = jax.random.normal(kx, (B, S, D), jnp.float32)
    params = init_params(kp)

    # One-time, outside-the-hot-path parameter packing (single slab -> 1 DMA).
    slab = jax.block_until_ready(pack_params(params))

    # Reference computed first (the kernel output may alias x's buffer).
    y_ref = mixer_block_ref(x, params)

    y = mixer_block(x, slab)
    y = jax.block_until_ready(y)

    assert jnp.allclose(y, y_ref, atol=1e-4, rtol=1e-4), "mismatch vs reference"

    print("KERNEL_OK")
</pallas_src>

<mosaic_0001>
module attributes {stable_mosaic.version = 11 : i64} {
  func.func @mixer_block_kernel(%arg0: memref<2x8x32xf32, #tpu.memory_space<vmem>>, %arg1: memref<200x128xf32, #tpu.memory_space<vmem>>, %arg2: memref<2x8x32xf32, #tpu.memory_space<vmem>>) attributes {dimension_semantics = [], scalar_prefetch = 0 : i64, scratch_operands = 0 : i64, tpu.core_type = #tpu.core_type<tc>} {
    %c0 = arith.constant 0 : index
    %c0_0 = arith.constant 0 : index
    %c0_1 = arith.constant 0 : index
    %0 = vector.load %arg0[%c0, %c0_0, %c0_1] : memref<2x8x32xf32, #tpu.memory_space<vmem>>, vector<2x8x32xf32>
    %1 = vector.shape_cast %0 : vector<2x8x32xf32> to vector<16x32xf32>
    %c0_2 = arith.constant 0 : index
    %c0_3 = arith.constant 0 : index
    %2 = vector.load %arg1[%c0_2, %c0_3] : memref<200x128xf32, #tpu.memory_space<vmem>>, vector<1x32xf32>
    %c1 = arith.constant 1 : index
    %c0_4 = arith.constant 0 : index
    %3 = vector.load %arg1[%c1, %c0_4] : memref<200x128xf32, #tpu.memory_space<vmem>>, vector<1x32xf32>
    %c2 = arith.constant 2 : index
    %c0_5 = arith.constant 0 : index
    %4 = vector.load %arg1[%c2, %c0_5] : memref<200x128xf32, #tpu.memory_space<vmem>>, vector<1x32xf32>
    %c3 = arith.constant 3 : index
    %c0_6 = arith.constant 0 : index
    %5 = vector.load %arg1[%c3, %c0_6] : memref<200x128xf32, #tpu.memory_space<vmem>>, vector<1x32xf32>
    %c4 = arith.constant 4 : index
    %c0_7 = arith.constant 0 : index
    %6 = vector.load %arg1[%c4, %c0_7] : memref<200x128xf32, #tpu.memory_space<vmem>>, vector<1x64xf32>
    %c5 = arith.constant 5 : index
    %c0_8 = arith.constant 0 : index
    %7 = vector.load %arg1[%c5, %c0_8] : memref<200x128xf32, #tpu.memory_space<vmem>>, vector<1x32xf32>
    %c8 = arith.constant 8 : index
    %c0_9 = arith.constant 0 : index
    %8 = vector.load %arg1[%c8, %c0_9] : memref<200x128xf32, #tpu.memory_space<vmem>>, vector<32x16xf32>
    %c40 = arith.constant 40 : index
    %c0_10 = arith.constant 0 : index
    %9 = vector.load %arg1[%c40, %c0_10] : memref<200x128xf32, #tpu.memory_space<vmem>>, vector<32x1xf32>
    %c72 = arith.constant 72 : index
    %c0_11 = arith.constant 0 : index
    %10 = vector.load %arg1[%c72, %c0_11] : memref<200x128xf32, #tpu.memory_space<vmem>>, vector<16x32xf32>
    %c88 = arith.constant 88 : index
    %c0_12 = arith.constant 0 : index
    %11 = vector.load %arg1[%c88, %c0_12] : memref<200x128xf32, #tpu.memory_space<vmem>>, vector<16x1xf32>
    %c104 = arith.constant 104 : index
    %c0_13 = arith.constant 0 : index
    %12 = vector.load %arg1[%c104, %c0_13] : memref<200x128xf32, #tpu.memory_space<vmem>>, vector<32x64xf32>
    %c136 = arith.constant 136 : index
    %c0_14 = arith.constant 0 : index
    %13 = vector.load %arg1[%c136, %c0_14] : memref<200x128xf32, #tpu.memory_space<vmem>>, vector<64x32xf32>
    %cst = arith.constant dense<0.000000e+00> : vector<16xf32>
    %14 = vector.multi_reduction <add>, %1, %cst [1] : vector<16x32xf32> to vector<16xf32>
    %15 = vector.shape_cast %14 : vector<16xf32> to vector<16x1xf32>
    %16 = arith.mulf %1, %1 : vector<16x32xf32>
    %cst_15 = arith.constant dense<0.000000e+00> : vector<16xf32>
    %17 = vector.multi_reduction <add>, %16, %cst_15 [1] : vector<16x32xf32> to vector<16xf32>
    %18 = vector.shape_cast %17 : vector<16xf32> to vector<16x1xf32>
    %cst_16 = arith.constant 3.125000e-02 : f32
    %19 = vector.broadcast %cst_16 : f32 to vector<16x1xf32>
    %20 = arith.mulf %15, %19 : vector<16x1xf32>
    %cst_17 = arith.constant 3.125000e-02 : f32
    %21 = vector.broadcast %cst_17 : f32 to vector<16x1xf32>
    %22 = arith.mulf %18, %21 : vector<16x1xf32>
    %23 = arith.mulf %20, %20 : vector<16x1xf32>
    %24 = arith.subf %22, %23 : vector<16x1xf32>
    %cst_18 = arith.constant 0.000000e+00 : f32
    %25 = vector.broadcast %cst_18 : f32 to vector<16x1xf32>
    %26 = arith.maximumf %24, %25 : vector<16x1xf32>
    %cst_19 = arith.constant 9.99999997E-7 : f32
    %27 = vector.broadcast %cst_19 : f32 to vector<16x1xf32>
    %28 = arith.addf %26, %27 : vector<16x1xf32>
    %29 = math.rsqrt %28 : vector<16x1xf32>
    %30 = vector.broadcast %20 : vector<16x1xf32> to vector<16x32xf32>
    %31 = arith.subf %1, %30 : vector<16x32xf32>
    %32 = vector.broadcast %29 : vector<16x1xf32> to vector<16x32xf32>
    %33 = arith.mulf %31, %32 : vector<16x32xf32>
    %34 = vector.broadcast %2 : vector<1x32xf32> to vector<16x32xf32>
    %35 = arith.mulf %33, %34 : vector<16x32xf32>
    %36 = vector.broadcast %3 : vector<1x32xf32> to vector<16x32xf32>
    %37 = arith.addf %35, %36 : vector<16x32xf32>
    %cst_20 = arith.constant dense<0.000000e+00> : vector<32x32xf32>
    %38 = tpu.matmul %8, %37, %cst_20 {dimension_numbers = #tpu.dot_dimension_numbers<[1], [0], [0], [1], [0, 0, 1, 1], [], []>} : vector<32x16xf32>, vector<16x32xf32>, vector<32x32xf32> -> vector<32x32xf32>
    %39 = vector.broadcast %9 : vector<32x1xf32> to vector<32x32xf32>
    %40 = arith.addf %38, %39 : vector<32x32xf32>
    %cst_21 = arith.constant 5.000000e-01 : f32
    %41 = vector.broadcast %cst_21 : f32 to vector<32x32xf32>
    %42 = arith.mulf %41, %40 : vector<32x32xf32>
    %cst_22 = arith.constant 0.707106769 : f32
    %43 = vector.broadcast %cst_22 : f32 to vector<32x32xf32>
    %44 = arith.mulf %40, %43 : vector<32x32xf32>
    %45 = math.erf %44 : vector<32x32xf32>
    %cst_23 = arith.constant 1.000000e+00 : f32
    %46 = vector.broadcast %cst_23 : f32 to vector<32x32xf32>
    %47 = arith.addf %46, %45 : vector<32x32xf32>
    %48 = arith.mulf %42, %47 : vector<32x32xf32>
    %cst_24 = arith.constant dense<0.000000e+00> : vector<16x32xf32>
    %49 = tpu.matmul %10, %48, %cst_24 {dimension_numbers = #tpu.dot_dimension_numbers<[1], [0], [0], [1], [0, 0, 1, 1], [], []>} : vector<16x32xf32>, vector<32x32xf32>, vector<16x32xf32> -> vector<16x32xf32>
    %50 = vector.broadcast %11 : vector<16x1xf32> to vector<16x32xf32>
    %51 = arith.addf %49, %50 : vector<16x32xf32>
    %52 = arith.addf %1, %51 : vector<16x32xf32>
    %cst_25 = arith.constant dense<0.000000e+00> : vector<16xf32>
    %53 = vector.multi_reduction <add>, %52, %cst_25 [1] : vector<16x32xf32> to vector<16xf32>
    %54 = vector.shape_cast %53 : vector<16xf32> to vector<16x1xf32>
    %55 = arith.mulf %52, %52 : vector<16x32xf32>
    %cst_26 = arith.constant dense<0.000000e+00> : vector<16xf32>
    %56 = vector.multi_reduction <add>, %55, %cst_26 [1] : vector<16x32xf32> to vector<16xf32>
    %57 = vector.shape_cast %56 : vector<16xf32> to vector<16x1xf32>
    %cst_27 = arith.constant 3.125000e-02 : f32
    %58 = vector.broadcast %cst_27 : f32 to vector<16x1xf32>
    %59 = arith.mulf %54, %58 : vector<16x1xf32>
    %cst_28 = arith.constant 3.125000e-02 : f32
    %60 = vector.broadcast %cst_28 : f32 to vector<16x1xf32>
    %61 = arith.mulf %57, %60 : vector<16x1xf32>
    %62 = arith.mulf %59, %59 : vector<16x1xf32>
    %63 = arith.subf %61, %62 : vector<16x1xf32>
    %cst_29 = arith.constant 0.000000e+00 : f32
    %64 = vector.broadcast %cst_29 : f32 to vector<16x1xf32>
    %65 = arith.maximumf %63, %64 : vector<16x1xf32>
    %cst_30 = arith.constant 9.99999997E-7 : f32
    %66 = vector.broadcast %cst_30 : f32 to vector<16x1xf32>
    %67 = arith.addf %65, %66 : vector<16x1xf32>
    %68 = math.rsqrt %67 : vector<16x1xf32>
    %69 = vector.broadcast %59 : vector<16x1xf32> to vector<16x32xf32>
    %70 = arith.subf %52, %69 : vector<16x32xf32>
    %71 = vector.broadcast %68 : vector<16x1xf32> to vector<16x32xf32>
    %72 = arith.mulf %70, %71 : vector<16x32xf32>
    %73 = vector.broadcast %4 : vector<1x32xf32> to vector<16x32xf32>
    %74 = arith.mulf %72, %73 : vector<16x32xf32>
    %75 = vector.broadcast %5 : vector<1x32xf32> to vector<16x32xf32>
    %76 = arith.addf %74, %75 : vector<16x32xf32>
    %cst_31 = arith.constant dense<0.000000e+00> : vector<16x64xf32>
    %77 = tpu.matmul %76, %12, %cst_31 {dimension_numbers = #tpu.dot_dimension_numbers<[1], [0], [0], [1], [0, 0, 1, 1], [], []>} : vector<16x32xf32>, vector<32x64xf32>, vector<16x64xf32> -> vector<16x64xf32>
    %78 = vector.broadcast %6 : vector<1x64xf32> to vector<16x64xf32>
    %79 = arith.addf %77, %78 : vector<16x64xf32>
    %cst_32 = arith.constant 5.000000e-01 : f32
    %80 = vector.broadcast %cst_32 : f32 to vector<16x64xf32>
    %81 = arith.mulf %80, %79 : vector<16x64xf32>
    %cst_33 = arith.constant 0.707106769 : f32
    %82 = vector.broadcast %cst_33 : f32 to vector<16x64xf32>
    %83 = arith.mulf %79, %82 : vector<16x64xf32>
    %84 = math.erf %83 : vector<16x64xf32>
    %cst_34 = arith.constant 1.000000e+00 : f32
    %85 = vector.broadcast %cst_34 : f32 to vector<16x64xf32>
    %86 = arith.addf %85, %84 : vector<16x64xf32>
    %87 = arith.mulf %81, %86 : vector<16x64xf32>
    %cst_35 = arith.constant dense<0.000000e+00> : vector<16x32xf32>
    %88 = tpu.matmul %87, %13, %cst_35 {dimension_numbers = #tpu.dot_dimension_numbers<[1], [0], [0], [1], [0, 0, 1, 1], [], []>} : vector<16x64xf32>, vector<64x32xf32>, vector<16x32xf32> -> vector<16x32xf32>
    %89 = vector.broadcast %7 : vector<1x32xf32> to vector<16x32xf32>
    %90 = arith.addf %88, %89 : vector<16x32xf32>
    %91 = arith.addf %52, %90 : vector<16x32xf32>
    %92 = vector.shape_cast %91 : vector<16x32xf32> to vector<2x8x32xf32>
    %c0_36 = arith.constant 0 : index
    %c0_37 = arith.constant 0 : index
    %c0_38 = arith.constant 0 : index
    %93 = vector.load %arg2[%c0_36, %c0_37, %c0_38] : memref<2x8x32xf32, #tpu.memory_space<vmem>>, vector<2x8x32xf32>
    tpu.vector_store %arg2[%c0_36, %c0_37, %c0_38], %92 {strides = array<i32>} : memref<2x8x32xf32, #tpu.memory_space<vmem>>, vector<2x8x32xf32>,
    return
  }
}

</mosaic_0001>

<bundles_post_ra>
// kernel: mixer_block.1
= control target key start
LH: loop header
LB: loop body
LE: loop exit
PB: predicated region body
PF: predicated region fallthrough
CT: control target
= control target key end

     0   :  { %7 = vsyncpa [#allocation3], 0  ;;  %s982_s0 = inlined_call_operand.hbm [shape: f32[2,8,32], index: 0, kind: input, shape index: {}, may-alias: {0,2}]   ;;  %s983_s1 = inlined_call_operand.hbm [shape: f32[200,128], index: 1, kind: input, shape index: {}]   ;;  %s984_s2 = inlined_call_operand.hbm [shape: f32[2,8,32], index: 2, kind: output, shape index: {}, may-alias: {0,2}]  }
   0x1   :  { %8 = vsyncpa [#allocation6], 0 }
   0x2   :  { %9 = vsyncpa [#allocation4], 0  ;;  %s14_s11 = sshll.u32 %s982_s0, 4  ;;  %s772_s12 = smov [#allocation2]   ;;  %s15_s11 = int_to_ptr.hbm [resolvable:$true] %s14_s11 }
   0x3   :  { %s16_s13 = sshll.u32 %s772_s12, 4  ;;  %s27_s16 = sshll.u32 %s983_s1, 4  ;;  %s17_s13 = int_to_ptr.vmem [resolvable:$true] %s16_s13  ;;  %s28_s16 = int_to_ptr.hbm [resolvable:$true] %s27_s16 }
   0x4   :  { %s773_s17 = smov 128   ;;  %s774_s18 = smov 8  }
   0x5   :  { %22 = dma.hbm_to_vmem [thread:$0]  %s15_s11, 256, %s17_s13, [#allocation3], %s773_s17, %s773_s17, %s774_s18  }
   0x6   :  { %s775_s19 = smov [#allocation5]  }
   0x7   :  { %s29_s20 = sshll.u32 %s775_s19, 4  ;;  %s30_s20 = int_to_ptr.vmem [resolvable:$true] %s29_s20 }
   0x8   :  { %35 = dma.hbm_to_vmem [thread:$0]  %s28_s16, 3200, %s30_s20, [#allocation6], %s773_s17, %s773_s17, %s774_s18  }
   0x9   :  { %766 = dma.done.wait [#allocation3], 256  }
   0xa   :  { %767 = vsyncadd [#allocation3], 4294967040 }
   0xb   :  { %768 = dma.done.wait [#allocation6], 3200  }
   0xc   :  { %769 = vsyncadd [#allocation6], 4294964096  ;;  %vm76_vm0 = vcmask 261120   ;;  %v805_v0 = vld [vmem:[#allocation2 + $0x8] sm:$0xff]  ;;  %v811_v3 = vld [vmem:[#allocation2] sm:$0xff]  ;;  %v776_v29 = vmov 0  }
   0xd   :  { %v80_v1 = vsel %vm76_vm0, %v805_v0, 0.0  ;;  %v84_v2 = vmul.f32 %v805_v0, %v805_v0  ;;  %v83_v5 = vmul.f32 %v811_v3, %v811_v3  ;;  %v77_v6 = vsel %vm76_vm0, %v811_v3, 0.0  ;;  %v56_v27 = vld [vmem:[#allocation5 + $0x28] sm:$0xff]  ;;  %667 = vset.pattern.permute.xlu1 %v776_v29  ;;  %666 = vset.pattern.permute.xlu0 %v776_v29  ;;  %v668_v35 = vld [vmem:[#allocation5] ss:$0 sm:$0xff]  ;;  %v57_v41 = vld [vmem:[#allocation5 + $0x30] sm:$0xff] }
   0xe   :  { %81 = vadd.xlane.f32.xlu0 %v80_v1  ;;  %665 = vset.pattern.permute.xlu2 %v776_v29  ;;  %v669_v39 = vld [vmem:[#allocation5 + $0x1] ss:$0 sm:$0xff]  ;;  %v58_v47 = vld [vmem:[#allocation5 + $0x38] sm:$0xff]  ;;  %v52_v53 = vld [vmem:[#allocation5 + $0x8] sm:$0xff]  ;;  %vm153_vm7 = vcmask 130048   ;;  %s777_s0 = smov [#allocation7]  }
   0xf   :  { %v88_v4 = vsel %vm76_vm0, %v84_v2, 0.0  ;;  %v85_v7 = vsel %vm76_vm0, %v83_v5, 0.0  ;;  %v59_v40 = vld [vmem:[#allocation5 + $0x40] sm:$0xff]  ;;  %v62_v55 = vld [vmem:[#allocation5 + $0x58] sm:$0xff]  ;;  %v53_v56 = vld [vmem:[#allocation5 + $0x10] sm:$0xff]  ;;  %s625_s1 = sshll.u32 %s777_s0, 4  ;;  %s626_s1 = int_to_ptr.vmem [resolvable:$true] %s625_s1 }
  0x10   :  { %89 = vadd.xlane.f32.xlu1 %v88_v4  ;;  %150 = vperm.xlu2 %665, %v59_v40   ;;  %v55_v54 = vld [vmem:[#allocation5 + $0x20] sm:$0xff]  ;;  %v54_v58 = vld [vmem:[#allocation5 + $0x18] sm:$0xff]  ;;  %s627_s23 = sshll.u32 %s984_s2, 4  ;;  %s628_s23 = int_to_ptr.hbm [resolvable:$true] %s627_s23 }
  0x11   :  { %v63_v57 = vld [vmem:[#allocation5 + $0x60] sm:$0xff] }
  0x16   :  { %78 = vadd.xlane.f32.xlu0 %v77_v6 }
  0x18   :  { %86 = vadd.xlane.f32.xlu1 %v85_v7  ;;  %145 = vperm.xlu2 %665, %v58_v47  }
  0x20   :  { %373 = vperm.xlu2 %665, %v62_v55  }
  0x28   :  { %378 = vperm.xlu2 %665, %v63_v57  }
  0x2a   :  { %140 = vperm.xlu0 %666, %v57_v41  }
  0x31   :  { %135 = vperm.xlu1 %667, %v56_v27  }
  0x6a   :  { %v151_v60 = vpop.permute.xlu2 %150 }
  0x81   :  { %v82_v8 = vpop.xlane.xlu0 %81 }
  0x82   :  { %v92_v9 = vmul.f32 0.03125, %v82_v8 }
  0x83   :  { %v90_v10 = vpop.xlane.xlu1 %89 }
  0x84   :  { %v96_v11 = vmul.f32 %v92_v9, %v92_v9  ;;  %v94_v12 = vmul.f32 0.03125, %v90_v10  ;;  %v124_v33 = vsub.f32 %v805_v0, %v92_v9 }
  0x86   :  { %v98_v13 = vsub.f32 %v94_v12, %v96_v11 }
  0x88   :  { %v100_v14 = vmax.f32 %v98_v13, 0.0 }
  0x89   :  { %v79_v15 = vpop.xlane.xlu0 %78 }
  0x8a   :  { %v102_v16 = vadd.f32 1e-06, %v100_v14  ;;  %v91_v17 = vmul.f32 0.03125, %v79_v15 }
  0x8b   :  { %v87_v18 = vpop.xlane.xlu1 %86 }
  0x8c   :  { %674 = vrsqrt.f32 %v102_v16  ;;  %v95_v19 = vmul.f32 %v91_v17, %v91_v17  ;;  %v93_v20 = vmul.f32 0.03125, %v87_v18  ;;  %vm119_vm2 = vweird.f32 %v102_v16 }
  0x8d   :  { %v123_v48 = vsub.f32 %v811_v3, %v91_v17 }
  0x8e   :  { %v97_v21 = vsub.f32 %v93_v20, %v95_v19 }
  0x90   :  { %v99_v22 = vmax.f32 %v97_v21, 0.0 }
  0x92   :  { %v675_v23 = vpop.eup %674  ;;  %v101_v25 = vadd.f32 1e-06, %v99_v22 }
  0x93   :  { %v114_v24 = vmul.f32 %v675_v23, %v102_v16  ;;  %vm120_vm1 = vweird.f32 %v675_v23 }
  0x94   :  { %676 = vrsqrt.f32 %v101_v25  ;;  %vm121_vm3 = vmor %vm119_vm2, %vm120_vm1  ;;  %vm109_vm5 = vweird.f32 %v101_v25 }
  0x95   :  { %v115_v26 = vmul.f32 %v675_v23, %v114_v24  ;;  %v146_v24 = vpop.permute.xlu2 %145 }
  0x97   :  { %v116_v28 = vmul.f32 0.5, %v115_v26 }
  0x99   :  { %v117_v30 = vsub.f32 1.5, %v116_v28 }
  0x9a   :  { %v677_v31 = vpop.eup %676 }
  0x9b   :  { %v118_v32 = vmul.f32 %v675_v23, %v117_v30  ;;  %v104_v34 = vmul.f32 %v677_v31, %v101_v25  ;;  %vm110_vm4 = vweird.f32 %v677_v31 }
  0x9c   :  { %vm111_vm6 = vmor %vm109_vm5, %vm110_vm4  ;;  %v141_v7 = vpop.permute.xlu0 %140 }
  0x9d   :  { %v122_v36 = vsel %vm121_vm3, %v675_v23, %v118_v32  ;;  %v105_v37 = vmul.f32 %v677_v31, %v104_v34 }
  0x9e   :  { %v126_v38 = vmul.f32 %v124_v33, %v122_v36 }
  0x9f   :  { %v106_v42 = vmul.f32 0.5, %v105_v37 }
  0xa0   :  { %v129_v43 = vmul.f32 %v668_v35, %v126_v38 }
  0xa1   :  { %v107_v44 = vsub.f32 1.5, %v106_v42 }
  0xa2   :  { %v132_v45 = vadd.f32 %v669_v39, %v129_v43 }
  0xa3   :  { %v108_v46 = vmul.f32 %v677_v31, %v107_v44  ;;  %v136_v59 = vpop.permute.xlu1 %135 }
  0xa4   :  { %180 = vmatpush.msra.mxu0 %v132_v45  ;;  %657 = vmatpush.msra.mxu1 %v132_v45 }
  0xa5   :  { %v112_v49 = vsel %vm111_vm6, %v677_v31, %v108_v46 }
  0xa6   :  { %v125_v50 = vmul.f32 %v123_v48, %v112_v49 }
  0xa8   :  { %v128_v51 = vmul.f32 %v668_v35, %v125_v50 }
  0xaa   :  { %v131_v52 = vadd.f32 %v669_v39, %v128_v51 }
  0xac   :  { %181 = vmatpush.msra.mxu0 %v131_v52  ;;  %658 = vmatpush.msra.mxu1 %v131_v52 }
  0xad   :  { %641 = vmatmul.msk.f32.vlgmr.msra.gmra.mxu0 %vm153_vm7, %v52_v53  ;;  %644 = vmatmul.msk.f32.vlgmr.msra.gmra.mxu1 %vm153_vm7, %v55_v54 }
  0xb5   :  { %642 = vmatmul.msk.f32.gmra.mxu0 %vm153_vm7, %v53_v56 }
  0xbd   :  { %643 = vmatmul.msk.f32.gmra.mxu0 %vm153_vm7, %v54_v58 }
 0x12a   :  { %v183_v61 = vpop.f32.mrf.mxu0  ;;  %v192_v62 = vpop.f32.mrf.mxu1 }
 0x12b   :  { %v821_v63 = vadd.f32 %v183_v61, %v136_v59  ;;  %v823_v1 = vadd.f32 %v192_v62, %v151_v60 }
 0x12d   :  { %v826_v2 = vmul.f32 0.70710677, %v821_v63  ;;  %v829_v4 = vmul.f32 0.70710677, %v823_v1 }
 0x12f   :  { %v203_v5 = vmul.f32 %v826_v2, %v826_v2  ;;  %v323_v6 = vmul.f32 %v829_v4, %v829_v4 }
 0x131   :  { %v835_v8 = vmin.f32 %v203_v5, 16.0  ;;  %v837_v9 = vmin.f32 %v323_v6, 16.0 }
 0x132   :  { %v186_v10 = vpop.f32.mrf.mxu0 }
 0x133   :  { %v325_v11 = vmul.f32 2.1237322e-06, %v837_v9  ;;  %v840_v12 = vadd.f32 %v186_v10, %v141_v7  ;;  %v336_v13 = vmul.f32 3.8918573e-05, %v837_v9  ;;  %v216_v14 = vmul.f32 3.8918573e-05, %v835_v8 }
 0x134   :  { %v205_v29 = vmul.f32 2.1237322e-06, %v835_v8 }
 0x135   :  { %v326_v15 = vadd.f32 0.00028619796, %v325_v11  ;;  %v845_v16 = vmul.f32 0.70710677, %v840_v12  ;;  %v337_v17 = vadd.f32 0.001143296, %v336_v13 }
 0x136   :  { %v217_v18 = vadd.f32 0.001143296, %v216_v14  ;;  %v206_v41 = vadd.f32 0.00028619796, %v205_v29 }
 0x137   :  { %v327_v19 = vmul.f32 %v326_v15, %v837_v9  ;;  %v243_v20 = vmul.f32 %v845_v16, %v845_v16  ;;  %v338_v21 = vmul.f32 %v337_v17, %v837_v9 }
 0x138   :  { %v218_v22 = vmul.f32 %v217_v18, %v835_v8  ;;  %v207_v52 = vmul.f32 %v206_v41, %v835_v8 }
 0x139   :  { %v328_v23 = vadd.f32 0.0036580483, %v327_v19  ;;  %v852_v25 = vmin.f32 %v243_v20, 16.0  ;;  %v339_v27 = vadd.f32 0.014752088, %v338_v21 }
 0x13a   :  { %v189_v26 = vpop.f32.mrf.mxu0  ;;  %v219_v28 = vadd.f32 0.014752088, %v218_v22  ;;  %v208_v6 = vadd.f32 0.0036580483, %v207_v52 }
 0x13b   :  { %v855_v30 = vadd.f32 %v189_v26, %v146_v24  ;;  %v245_v31 = vmul.f32 2.1237322e-06, %v852_v25  ;;  %v340_v32 = vmul.f32 %v339_v27, %v837_v9  ;;  %v256_v33 = vmul.f32 3.8918573e-05, %v852_v25 }
 0x13c   :  { %v220_v34 = vmul.f32 %v219_v28, %v835_v8  ;;  %v329_v35 = vmul.f32 %v328_v23, %v837_v9  ;;  %v209_v19 = vmul.f32 %v208_v6, %v835_v8 }
 0x13d   :  { %v246_v36 = vadd.f32 0.00028619796, %v245_v31  ;;  %v863_v37 = vmul.f32 0.70710677, %v855_v30  ;;  %v341_v38 = vadd.f32 0.112945676, %v340_v32 }
 0x13e   :  { %v257_v39 = vadd.f32 0.001143296, %v256_v33  ;;  %v221_v40 = vadd.f32 0.112945676, %v220_v34  ;;  %v330_v47 = vadd.f32 0.05243302, %v329_v35 }
 0x13f   :  { %v283_v42 = vmul.f32 %v863_v37, %v863_v37  ;;  %v342_v43 = vmul.f32 %v341_v38, %v837_v9  ;;  %v247_v44 = vmul.f32 %v246_v36, %v852_v25  ;;  %v210_v31 = vadd.f32 0.05243302, %v209_v19 }
 0x140   :  { %v258_v45 = vmul.f32 %v257_v39, %v852_v25  ;;  %v222_v46 = vmul.f32 %v221_v40, %v835_v8  ;;  %v331_v58 = vmul.f32 %v330_v47, %v837_v9 }
 0x141   :  { %v871_v48 = vmin.f32 %v283_v42, 16.0  ;;  %v343_v49 = vadd.f32 0.4994258, %v342_v43  ;;  %v248_v56 = vadd.f32 0.0036580483, %v247_v44  ;;  %v211_v43 = vmul.f32 %v210_v31, %v835_v8 }
 0x142   :  { %v259_v50 = vadd.f32 0.014752088, %v258_v45  ;;  %v223_v51 = vadd.f32 0.4994258, %v222_v46  ;;  %v332_v14 = vadd.f32 0.18741608, %v331_v58 }
 0x143   :  { %v285_v53 = vmul.f32 2.1237322e-06, %v871_v48  ;;  %v344_v54 = vmul.f32 %v343_v49, %v837_v9  ;;  %v296_v55 = vmul.f32 3.8918573e-05, %v871_v48  ;;  %v249_v10 = vmul.f32 %v248_v56, %v852_v25 }
 0x144   :  { %v260_v57 = vmul.f32 %v259_v50, %v852_v25  ;;  %v224_v61 = vmul.f32 %v223_v51, %v835_v8  ;;  %v333_v26 = vmul.f32 %v332_v14, %v837_v9 }
 0x145   :  { %v286_v59 = vadd.f32 0.00028619796, %v285_v53  ;;  %v345_v60 = vadd.f32 1.0, %v344_v54  ;;  %v297_v62 = vadd.f32 0.001143296, %v296_v55 }
 0x146   :  { %v261_v5 = vadd.f32 0.112945676, %v260_v57  ;;  %v884_v15 = vadd.f32 1.0, %v224_v61  ;;  %v250_v21 = vadd.f32 0.05243302, %v249_v10 }
 0x147   :  { %v287_v7 = vmul.f32 %v286_v59, %v871_v48  ;;  %678 = vrcp.f32 %v345_v60  ;;  %v298_v11 = vmul.f32 %v297_v62, %v871_v48  ;;  %v334_v38 = vadd.f32 1.1283791, %v333_v26 }
 0x148   :  { %v262_v13 = vmul.f32 %v261_v5, %v852_v25  ;;  %680 = vrcp.f32 %v884_v15  ;;  %v251_v33 = vmul.f32 %v250_v21, %v852_v25  ;;  %v355_v39 = vand.u32 2147483647, %v345_v60 }
 0x149   :  { %v299_v17 = vadd.f32 0.014752088, %v298_v11  ;;  %v288_v20 = vadd.f32 0.0036580483, %v287_v7  ;;  %v357_v40 = vand.u32 2147483648, %v345_v60  ;;  %vm351_vm9 = vweird.f32 %v345_v60 }
 0x14a   :  { %v263_v18 = vadd.f32 0.4994258, %v262_v13  ;;  %v252_v45 = vadd.f32 0.18741608, %v251_v33  ;;  %v335_v52 = vmul.f32 %v334_v38, %v829_v4  ;;  %vm356_vm11 = vcmp.eq.f32.partialorder %v355_v39, 8.507059e+37 }
 0x14b   :  { %v300_v22 = vmul.f32 %v299_v17, %v871_v48  ;;  %v289_v32 = vmul.f32 %v288_v20, %v871_v48  ;;  %v358_v49 = vor.u32 1.1754944e-38, %v357_v40  ;;  %v212_v55 = vadd.f32 0.18741608, %v211_v43 }
 0x14c   :  { %v264_v23 = vmul.f32 %v263_v18, %v852_v25  ;;  %v253_v59 = vmul.f32 %v252_v45, %v852_v25  ;;  %v198_v5 = vmul.f32 0.5, %v823_v1  ;;  %v235_v20 = vand.u32 2147483647, %v884_v15 }
 0x14d   :  { %v679_v24 = vpop.eup %678  ;;  %v301_v28 = vadd.f32 0.112945676, %v300_v22  ;;  %v290_v44 = vadd.f32 0.05243302, %v289_v32  ;;  %v213_v4 = vmul.f32 %v212_v55, %v835_v8  ;;  %v237_v21 = vand.u32 2147483648, %v884_v15 }
 0x14e   :  { %v347_v27 = vmul.f32 %v679_v24, %v345_v60  ;;  %v891_v29 = vadd.f32 1.0, %v264_v23  ;;  %v897_v36 = vpop.eup %680  ;;  %vm352_vm8 = vweird.f32 %v679_v24  ;;  %v254_v11 = vadd.f32 1.1283791, %v253_v59 }
 0x14f   :  { %v302_v35 = vmul.f32 %v301_v28, %v871_v48  ;;  %v227_v42 = vmul.f32 %v897_v36, %v884_v15  ;;  %vm353_vm10 = vmor %vm351_vm9, %vm352_vm8  ;;  %v291_v56 = vmul.f32 %v290_v44, %v871_v48  ;;  %vm232_vm14 = vweird.f32 %v897_v36 }
 0x150   :  { %v348_v34 = vsub.f32 1.0, %v347_v27  ;;  %682 = vrcp.f32 %v891_v29  ;;  %vm271_vm13 = vweird.f32 %v891_v29  ;;  %v277_v14 = vand.u32 2147483648, %v891_v29 }
 0x151   :  { %v303_v41 = vadd.f32 0.4994258, %v302_v35  ;;  %v228_v50 = vsub.f32 1.0, %v227_v42  ;;  %v292_v7 = vadd.f32 0.18741608, %v291_v56  ;;  %vm231_vm1 = vweird.f32 %v884_v15  ;;  %v60_v56 = vld [vmem:[#allocation5 + $0x48] sm:$0xff] }
 0x152   :  { %v349_v9 = vmul.f32 %v679_v24, %v348_v34  ;;  %v275_v17 = vand.u32 2147483647, %v891_v29  ;;  %v214_v26 = vadd.f32 1.1283791, %v213_v4  ;;  %v278_v27 = vor.u32 1.1754944e-38, %v277_v14  ;;  %vm233_vm2 = vmor %vm231_vm1, %vm232_vm14 }
 0x153   :  { %v304_v47 = vmul.f32 %v303_v41, %v871_v48  ;;  %v229_v62 = vmul.f32 %v897_v36, %v228_v50  ;;  %v293_v22 = vmul.f32 %v292_v7, %v871_v48  ;;  %v255_v28 = vmul.f32 %v254_v11, %v845_v16 }
 0x154   :  { %v350_v46 = vadd.f32 %v679_v24, %v349_v9  ;;  %vm276_vm3 = vcmp.eq.f32.partialorder %v275_v17, 8.507059e+37  ;;  %vm236_vm4 = vcmp.eq.f32.partialorder %v235_v20, 8.507059e+37  ;;  %v238_v48 = vor.u32 1.1754944e-38, %v237_v21  ;;  %v66_v17 = vld [vmem:[#allocation5 + $0x78] sm:$0xff] }
 0x155   :  { %v305_v54 = vadd.f32 1.0, %v304_v47  ;;  %v230_v18 = vadd.f32 %v897_v36, %v229_v62  ;;  %v294_v34 = vadd.f32 1.1283791, %v293_v22  ;;  %v215_v15 = vmul.f32 %v214_v26, %v826_v2 }
 0x156   :  { %v683_v51 = vpop.eup %682  ;;  %v354_v53 = vsel %vm353_vm10, %v679_v24, %v350_v46  ;;  %v196_v2 = vmul.f32 0.5, %v840_v12 }
 0x157   :  { %v359_v57 = vsel %vm356_vm11, %v358_v49, %v354_v53  ;;  %v267_v58 = vmul.f32 %v683_v51, %v891_v29  ;;  %684 = vrcp.f32 %v305_v54  ;;  %vm272_vm12 = vweird.f32 %v683_v51 }
 0x158   :  { %v360_v60 = vmul.f32 %v359_v57, %v335_v52  ;;  %vm915_vm15 = vmor %vm271_vm13, %vm272_vm12  ;;  %v234_v31 = vsel %vm233_vm2, %v897_v36, %v230_v18  ;;  %v317_v32 = vand.u32 2147483648, %v305_v54  ;;  %v315_v38 = vand.u32 2147483647, %v305_v54  ;;  %v61_v57 = vld [vmem:[#allocation5 + $0x50] sm:$0xff] }
 0x159   :  { %v268_v61 = vsub.f32 1.0, %v267_v58  ;;  %v239_v39 = vsel %vm236_vm4, %v238_v48, %v234_v31  ;;  %vm311_vm6 = vweird.f32 %v305_v54  ;;  %v295_v41 = vmul.f32 %v294_v34, %v863_v37 }
 0x15a   :  { %v648_v6 = vclamps-f32 %v360_v60, 1.0  ;;  %v318_v16 = vor.u32 1.1754944e-38, %v317_v32  ;;  %vm316_vm8 = vcmp.eq.f32.partialorder %v315_v38, 8.507059e+37  ;;  %v240_v36 = vmul.f32 %v239_v39, %v215_v15 }
 0x15b   :  { %v269_v10 = vmul.f32 %v683_v51, %v268_v61  ;;  %v197_v49 = vmul.f32 0.5, %v855_v30  ;;  %v374_v30 = vpop.permute.xlu2 %373 }
 0x15c   :  { %v366_v13 = vadd.f32 1.0, %v648_v6  ;;  %v645_v47 = vclamps-f32 %v240_v36, 1.0  ;;  %v671_v36 = vld [vmem:[#allocation5 + $0x3] ss:$0 sm:$0xff] }
 0x15d   :  { %v270_v25 = vadd.f32 %v683_v51, %v269_v10  ;;  %v685_v1 = vpop.eup %684 }
 0x15e   :  { %v370_v19 = vmul.f32 %v366_v13, %v198_v5  ;;  %v307_v23 = vmul.f32 %v685_v1, %v305_v54  ;;  %vm312_vm5 = vweird.f32 %v685_v1  ;;  %v363_v53 = vadd.f32 1.0, %v645_v47  ;;  %v67_v13 = vld [vmem:[#allocation5 + $0x80] sm:$0xff] }
 0x15f   :  { %v274_v24 = vsel %vm915_vm15, %v683_v51, %v270_v25  ;;  %vm313_vm7 = vmor %vm311_vm6, %vm312_vm5  ;;  %v195_v54 = vmul.f32 0.5, %v821_v63  ;;  %487 = vmatpush.msra.mxu2 %v67_v13  ;;  %v73_v13 = vld [vmem:[#allocation5 + $0xb0] sm:$0xff]  ;;  %vm587_vm6 = vcmask 523264  }
 0x160   :  { %399 = vmatpush.msrb.mxu1 %v370_v19  ;;  %v308_v29 = vsub.f32 1.0, %v307_v23  ;;  %v279_v33 = vsel %vm276_vm3, %v278_v27, %v274_v24  ;;  %v64_v19 = vld [vmem:[#allocation5 + $0x68] sm:$0xff] }
 0x161   :  { %v280_v9 = vmul.f32 %v279_v33, %v255_v28  ;;  %v367_v55 = vmul.f32 %v363_v53, %v195_v54  ;;  %488 = vmatpush.msra.mxu2 %v66_v17  ;;  %v672_v53 = vld [vmem:[#allocation5 + $0x4] ss:$0 sm:$0xff] }
 0x162   :  { %v309_v35 = vmul.f32 %v685_v1, %v308_v29 }
 0x163   :  { %v646_v45 = vclamps-f32 %v280_v9, 1.0  ;;  %v379_v62 = vpop.permute.xlu2 %378  ;;  %v670_v9 = vld [vmem:[#allocation5 + $0x2] ss:$0 sm:$0xff] }
 0x164   :  { %v310_v40 = vadd.f32 %v685_v1, %v309_v35 }
 0x165   :  { %v364_v51 = vadd.f32 1.0, %v646_v45 }
 0x166   :  { %v314_v42 = vsel %vm313_vm7, %v685_v1, %v310_v40 }
 0x167   :  { %v319_v43 = vsel %vm316_vm8, %v318_v16, %v314_v42  ;;  %v368_v37 = vmul.f32 %v364_v51, %v196_v2 }
 0x168   :  { %v320_v44 = vmul.f32 %v319_v43, %v295_v41 }
 0x16a   :  { %v647_v46 = vclamps-f32 %v320_v44, 1.0 }
 0x16c   :  { %v365_v50 = vadd.f32 1.0, %v647_v46 }
 0x16e   :  { %v369_v52 = vmul.f32 %v365_v50, %v197_v49 }
 0x170   :  { %400 = vmatpush.msrb.mxu1 %v369_v52 }
 0x172   :  { %401 = vmatpush.msrb.mxu1 %v368_v37 }
 0x174   :  { %402 = vmatpush.msrb.mxu1 %v367_v55 }
 0x175   :  { %649 = vmatmul.msk.f32.vlgmr.msrb.gmra.mxu1 %vm76_vm0, %v60_v56 }
 0x17d   :  { %650 = vmatmul.msk.f32.gmra.mxu1 %vm76_vm0, %v61_v57 }
 0x1f2   :  { %v404_v58 = vpop.f32.mrf.mxu1 }
 0x1f3   :  { %v405_v59 = vadd.f32 %v404_v58, %v374_v30 }
 0x1f5   :  { %v935_v12 = vadd.f32 %v405_v59, %v811_v3 }
 0x1f7   :  { %v412_v63 = vsel %vm76_vm0, %v935_v12, 0.0  ;;  %v418_v60 = vmul.f32 %v935_v12, %v935_v12 }
 0x1f8   :  { %413 = vadd.xlane.f32.xlu2 %v412_v63 }
 0x1f9   :  { %v420_v61 = vsel %vm76_vm0, %v418_v60, 0.0 }
 0x1fa   :  { %v407_v5 = vpop.f32.mrf.mxu1  ;;  %421 = vadd.xlane.f32.xlu1 %v420_v61 }
 0x1fb   :  { %v408_v6 = vadd.f32 %v407_v5, %v379_v62  ;;  %v75_v62 = vld [vmem:[#allocation5 + $0xc0] sm:$0xff] }
 0x1fc   :  { %602 = vmatpush.msra.mxu3 %v75_v62 }
 0x1fd   :  { %v943_v4 = vadd.f32 %v408_v6, %v805_v0  ;;  %v65_v0 = vld [vmem:[#allocation5 + $0x70] sm:$0xff] }
 0x1fe   :  { %489 = vmatpush.msra.mxu2 %v65_v0 }
 0x1ff   :  { %v415_v3 = vsel %vm76_vm0, %v943_v4, 0.0  ;;  %v419_v7 = vmul.f32 %v943_v4, %v943_v4 }
 0x200   :  { %416 = vadd.xlane.f32.xlu0 %v415_v3  ;;  %490 = vmatpush.msra.mxu2 %v64_v19 }
 0x201   :  { %v423_v10 = vsel %vm76_vm0, %v419_v7, 0.0  ;;  %v74_v7 = vld [vmem:[#allocation5 + $0xb8] sm:$0xff] }
 0x202   :  { %424 = vadd.xlane.f32.xlu2 %v423_v10  ;;  %603 = vmatpush.msra.mxu3 %v74_v7 }
 0x204   :  { %604 = vmatpush.msra.mxu3 %v73_v13 }
 0x26b   :  { %v414_v11 = vpop.xlane.xlu2 %413 }
 0x26c   :  { %v426_v14 = vmul.f32 0.03125, %v414_v11 }
 0x26d   :  { %v422_v25 = vpop.xlane.xlu1 %421 }
 0x26e   :  { %v430_v18 = vmul.f32 %v426_v14, %v426_v14  ;;  %v428_v1 = vmul.f32 0.03125, %v422_v25  ;;  %v458_v15 = vsub.f32 %v935_v12, %v426_v14 }
 0x270   :  { %v432_v8 = vsub.f32 %v428_v1, %v430_v18  ;;  %v72_v18 = vld [vmem:[#allocation5 + $0xa8] sm:$0xff] }
 0x271   :  { %605 = vmatpush.msra.mxu3 %v72_v18 }
 0x272   :  { %v434_v20 = vmax.f32 %v432_v8, 0.0  ;;  %v71_v8 = vld [vmem:[#allocation5 + $0xa0] sm:$0xff] }
 0x273   :  { %v417_v21 = vpop.xlane.xlu0 %416  ;;  %606 = vmatpush.msra.mxu3 %v71_v8 }
 0x274   :  { %v436_v22 = vadd.f32 1e-06, %v434_v20  ;;  %v427_v23 = vmul.f32 0.03125, %v417_v21 }
 0x275   :  { %v425_v24 = vpop.xlane.xlu2 %424 }
 0x276   :  { %686 = vrsqrt.f32 %v436_v22  ;;  %v431_v26 = vmul.f32 %v427_v23, %v427_v23  ;;  %v429_v27 = vmul.f32 0.03125, %v425_v24  ;;  %vm444_vm10 = vweird.f32 %v436_v22  ;;  %v70_v24 = vld [vmem:[#allocation5 + $0x98] sm:$0xff] }
 0x277   :  { %v459_v49 = vsub.f32 %v943_v4, %v427_v23  ;;  %607 = vmatpush.msra.mxu3 %v70_v24 }
 0x278   :  { %v433_v28 = vsub.f32 %v429_v27, %v431_v26 }
 0x27a   :  { %v435_v29 = vmax.f32 %v433_v28, 0.0 }
 0x27c   :  { %v687_v31 = vpop.eup %686  ;;  %v437_v33 = vadd.f32 1e-06, %v435_v29  ;;  %v69_v29 = vld [vmem:[#allocation5 + $0x90] sm:$0xff] }
 0x27d   :  { %v439_v32 = vmul.f32 %v687_v31, %v436_v22  ;;  %vm445_vm9 = vweird.f32 %v687_v31  ;;  %608 = vmatpush.msra.mxu3 %v69_v29 }
 0x27e   :  { %688 = vrsqrt.f32 %v437_v33  ;;  %vm446_vm11 = vmor %vm444_vm10, %vm445_vm9  ;;  %vm454_vm13 = vweird.f32 %v437_v33 }
 0x27f   :  { %v440_v48 = vmul.f32 %v687_v31, %v439_v32 }
 0x281   :  { %v441_v34 = vmul.f32 0.5, %v440_v48 }
 0x283   :  { %v442_v35 = vsub.f32 1.5, %v441_v34 }
 0x284   :  { %v689_v38 = vpop.eup %688 }
 0x285   :  { %v443_v39 = vmul.f32 %v687_v31, %v442_v35  ;;  %v449_v40 = vmul.f32 %v689_v38, %v437_v33  ;;  %vm455_vm12 = vweird.f32 %v689_v38 }
 0x286   :  { %vm456_vm14 = vmor %vm454_vm13, %vm455_vm12 }
 0x287   :  { %v447_v16 = vsel %vm446_vm11, %v687_v31, %v443_v39  ;;  %v450_v41 = vmul.f32 %v689_v38, %v449_v40  ;;  %v68_v31 = vld [vmem:[#allocation5 + $0x88] sm:$0xff] }
 0x288   :  { %v460_v42 = vmul.f32 %v458_v15, %v447_v16  ;;  %609 = vmatpush.msra.mxu3 %v68_v31 }
 0x289   :  { %v451_v43 = vmul.f32 0.5, %v450_v41 }
 0x28a   :  { %v463_v44 = vmul.f32 %v670_v9, %v460_v42 }
 0x28b   :  { %v452_v45 = vsub.f32 1.5, %v451_v43 }
 0x28c   :  { %v466_v46 = vadd.f32 %v671_v36, %v463_v44 }
 0x28d   :  { %v453_v47 = vmul.f32 %v689_v38, %v452_v45 }
 0x28e   :  { %651 = vmatmul.msk.f32.vlgmr.msra.gmra.mxu2 %vm76_vm0, %v466_v46 }
 0x28f   :  { %v457_v50 = vsel %vm456_vm14, %v689_v38, %v453_v47 }
 0x290   :  { %v461_v51 = vmul.f32 %v459_v49, %v457_v50 }
 0x292   :  { %v464_v2 = vmul.f32 %v670_v9, %v461_v51 }
 0x294   :  { %v467_v52 = vadd.f32 %v671_v36, %v464_v2 }
 0x296   :  { %652 = vmatmul.msk.f32.gmra.mxu2 %vm76_vm0, %v467_v52 }
 0x311   :  { %v492_v54 = vpop.f32.mrf.mxu2 }
 0x312   :  { %v954_v37 = vadd.f32 %v672_v53, %v492_v54 }
 0x314   :  { %v957_v55 = vmul.f32 0.70710677, %v954_v37 }
 0x316   :  { %v502_v56 = vmul.f32 %v957_v55, %v957_v55 }
 0x318   :  { %v503_v57 = vmin.f32 %v502_v56, 16.0 }
 0x319   :  { %v495_v59 = vpop.f32.mrf.mxu2 }
 0x31a   :  { %v504_v30 = vmul.f32 2.1237322e-06, %v503_v57  ;;  %v515_v58 = vmul.f32 3.8918573e-05, %v503_v57  ;;  %v961_v63 = vadd.f32 %v672_v53, %v495_v59 }
 0x31c   :  { %v505_v60 = vadd.f32 0.00028619796, %v504_v30  ;;  %v516_v61 = vadd.f32 0.001143296, %v515_v58  ;;  %v964_v5 = vmul.f32 0.70710677, %v961_v63 }
 0x31e   :  { %v506_v6 = vmul.f32 %v505_v60, %v503_v57  ;;  %v517_v3 = vmul.f32 %v516_v61, %v503_v57  ;;  %v542_v10 = vmul.f32 %v964_v5, %v964_v5 }
 0x320   :  { %v518_v11 = vadd.f32 0.014752088, %v517_v3  ;;  %v507_v14 = vadd.f32 0.0036580483, %v506_v6  ;;  %v543_v25 = vmin.f32 %v542_v10, 16.0 }
 0x322   :  { %v519_v17 = vmul.f32 %v518_v11, %v503_v57  ;;  %v544_v1 = vmul.f32 2.1237322e-06, %v543_v25  ;;  %v555_v0 = vmul.f32 3.8918573e-05, %v543_v25  ;;  %v508_v20 = vmul.f32 %v507_v14, %v503_v57 }
 0x323   :  { %v498_v14 = vmul.f32 0.5, %v954_v37  ;;  %v673_v37 = vld [vmem:[#allocation5 + $0x5] ss:$0 sm:$0xff] }
 0x324   :  { %v520_v19 = vadd.f32 0.112945676, %v519_v17  ;;  %v545_v21 = vadd.f32 0.00028619796, %v544_v1  ;;  %v556_v22 = vadd.f32 0.001143296, %v555_v0 }
 0x325   :  { %v509_v32 = vadd.f32 0.05243302, %v508_v20 }
 0x326   :  { %v521_v23 = vmul.f32 %v520_v19, %v503_v57  ;;  %v546_v26 = vmul.f32 %v545_v21, %v543_v25  ;;  %v557_v27 = vmul.f32 %v556_v22, %v543_v25  ;;  %v499_v21 = vmul.f32 0.5, %v961_v63 }
 0x327   :  { %v510_v39 = vmul.f32 %v509_v32, %v503_v57 }
 0x328   :  { %v522_v28 = vadd.f32 0.4994258, %v521_v23  ;;  %v558_v33 = vadd.f32 0.014752088, %v557_v27  ;;  %v547_v34 = vadd.f32 0.0036580483, %v546_v26 }
 0x329   :  { %v511_v16 = vadd.f32 0.18741608, %v510_v39 }
 0x32a   :  { %v523_v48 = vmul.f32 %v522_v28, %v503_v57  ;;  %v559_v35 = vmul.f32 %v558_v33, %v543_v25  ;;  %v548_v40 = vmul.f32 %v547_v34, %v543_v25 }
 0x32b   :  { %v512_v44 = vmul.f32 %v511_v16, %v503_v57 }
 0x32c   :  { %v524_v38 = vadd.f32 1.0, %v523_v48  ;;  %v560_v15 = vadd.f32 0.112945676, %v559_v35  ;;  %v549_v42 = vadd.f32 0.05243302, %v548_v40 }
 0x32d   :  { %v513_v51 = vadd.f32 1.1283791, %v512_v44 }
 0x32e   :  { %690 = vrcp.f32 %v524_v38  ;;  %v561_v9 = vmul.f32 %v560_v15, %v543_v25  ;;  %v550_v47 = vmul.f32 %v549_v42, %v543_v25  ;;  %v536_v50 = vand.u32 2147483648, %v524_v38 }
 0x32f   :  { %v534_v52 = vand.u32 2147483647, %v524_v38  ;;  %vm530_vm1 = vweird.f32 %v524_v38  ;;  %v514_v58 = vmul.f32 %v513_v51, %v957_v55 }
 0x330   :  { %v562_v41 = vadd.f32 0.4994258, %v561_v9  ;;  %v551_v53 = vadd.f32 0.18741608, %v550_v47  ;;  %v537_v56 = vor.u32 1.1754944e-38, %v536_v50 }
 0x331   :  { %vm535_vm3 = vcmp.eq.f32.partialorder %v534_v52, 8.507059e+37 }
 0x332   :  { %v563_v36 = vmul.f32 %v562_v41, %v543_v25  ;;  %v552_v60 = vmul.f32 %v551_v53, %v543_v25 }
 0x334   :  { %v691_v43 = vpop.eup %690  ;;  %v564_v46 = vadd.f32 1.0, %v563_v36  ;;  %v553_v10 = vadd.f32 1.1283791, %v552_v60 }
 0x335   :  { %v526_v45 = vmul.f32 %v691_v43, %v524_v38  ;;  %vm531_vm15 = vweird.f32 %v691_v43 }
 0x336   :  { %692 = vrcp.f32 %v564_v46  ;;  %vm532_vm2 = vmor %vm530_vm1, %vm531_vm15  ;;  %v576_v3 = vand.u32 2147483648, %v564_v46  ;;  %v574_v13 = vand.u32 2147483647, %v564_v46  ;;  %vm570_vm5 = vweird.f32 %v564_v46 }
 0x337   :  { %v527_v49 = vsub.f32 1.0, %v526_v45  ;;  %v554_v25 = vmul.f32 %v553_v10, %v964_v5 }
 0x338   :  { %v577_v55 = vor.u32 1.1754944e-38, %v576_v3  ;;  %vm575_vm8 = vcmp.eq.f32.partialorder %v574_v13, 8.507059e+37 }
 0x339   :  { %v528_v2 = vmul.f32 %v691_v43, %v527_v49 }
 0x33b   :  { %v529_v54 = vadd.f32 %v691_v43, %v528_v2 }
 0x33c   :  { %v693_v30 = vpop.eup %692 }
 0x33d   :  { %v533_v59 = vsel %vm532_vm2, %v691_v43, %v529_v54  ;;  %v566_v61 = vmul.f32 %v693_v30, %v564_v46  ;;  %vm571_vm4 = vweird.f32 %v693_v30 }
 0x33e   :  { %v538_v57 = vsel %vm535_vm3, %v537_v56, %v533_v59  ;;  %vm572_vm7 = vmor %vm570_vm5, %vm571_vm4 }
 0x33f   :  { %v539_v62 = vmul.f32 %v538_v57, %v514_v58  ;;  %v567_v6 = vsub.f32 1.0, %v566_v61 }
 0x341   :  { %v653_v7 = vclamps-f32 %v539_v62, 1.0  ;;  %v568_v11 = vmul.f32 %v693_v30, %v567_v6 }
 0x343   :  { %v582_v17 = vadd.f32 1.0, %v653_v7  ;;  %v569_v18 = vadd.f32 %v693_v30, %v568_v11 }
 0x345   :  { %v584_v1 = vmul.f32 %v582_v17, %v498_v14  ;;  %v573_v0 = vsel %vm572_vm7, %v693_v30, %v569_v18 }
 0x346   :  { %v578_v19 = vsel %vm575_vm8, %v577_v55, %v573_v0 }
 0x347   :  { %655 = vmatmul.msk.f32.vlgmr.msra.gmra.mxu3 %vm587_vm6, %v584_v1  ;;  %v579_v8 = vmul.f32 %v578_v19, %v554_v25 }
 0x349   :  { %v654_v20 = vclamps-f32 %v579_v8, 1.0 }
 0x34b   :  { %v583_v22 = vadd.f32 1.0, %v654_v20 }
 0x34d   :  { %v585_v23 = vmul.f32 %v583_v22, %v499_v21 }
 0x34f   :  { %656 = vmatmul.msk.f32.gmra.mxu3 %vm587_vm6, %v585_v23 }
 0x3ca   :  { %v611_v24 = vpop.f32.mrf.mxu3 }
 0x3cb   :  { %v612_v26 = vadd.f32 %v673_v37, %v611_v24 }
 0x3cd   :  { %v617_v27 = vadd.f32 %v612_v26, %v935_v12 }
 0x3cf   :  { %619 = vst.msk [vmem:[#allocation7] sm:$0xff] %vm76_vm0, %v617_v27 }
 0x3d2   :  { %v614_v28 = vpop.f32.mrf.mxu3 }
 0x3d3   :  { %v615_v5 = vadd.f32 %v673_v37, %v614_v28 }
 0x3d5   :  { %v618_v63 = vadd.f32 %v615_v5, %v943_v4 }
 0x3d7   :  { %620 = vst.msk [vmem:[#allocation7 + $0x8] sm:$0xff] %vm76_vm0, %v618_v63 }
 0x3d8   :  { %633 = dma.vmem_to_hbm [thread:$0]  %s626_s1, 256, %s628_s23, [#allocation4], %s773_s17, %s773_s17, %s774_s18  }
 0x3d9   :  { %770 = dma.done.wait [#allocation4], 256  }
 0x3da   :  { %771 = vsyncadd [#allocation4], 4294967040 }
 0x3db   :  { %638 = vsyncpa [#allocation3], 1 }
 0x3dc   :  { %639 = vsyncpa [#allocation6], 1 }
 0x3dd   :  { %640 = vsyncpa [#allocation4], 1 }

</bundles_post_ra>
